<compile_context>
chip_gen: v7x
topology: tpu7x:2x2x1
jax: 0.10.0
libtpu: 0.0.40
codegen_flags: <defaults>
</compile_context>

<pallas_src>
import functools

import jax
import jax.numpy as jnp
from jax.experimental import pallas as pl
from jax.experimental.pallas import tpu as pltpu

F_IN = 28 * 28      # 784
HID = 64
N_CLASSES = 10


def mlp_kernel(x_ref, w1_ref, b1_ref, w2_ref, b2_ref,
               w3_ref, b3_ref, w4_ref, b4_ref, o_ref):
    # x tile: (tb, 784) f32 -> cast to bf16 in-kernel (keeps HBM traffic to a
    # single f32 read of x, no separate XLA prep pass).
    x = x_ref[...].astype(jnp.bfloat16)

    h = jnp.dot(x, w1_ref[...], preferred_element_type=jnp.float32) + b1_ref[...]
    h = jnp.maximum(h, 0.0)

    h = jnp.dot(h.astype(jnp.bfloat16), w2_ref[...],
                preferred_element_type=jnp.float32) + b2_ref[...]
    h = jnp.maximum(h, 0.0)

    h = jnp.dot(h.astype(jnp.bfloat16), w3_ref[...],
                preferred_element_type=jnp.float32) + b3_ref[...]
    h = jnp.maximum(h, 0.0)

    # Unpadded 10-class logits; log_softmax over the real columns only.
    z = jnp.dot(h.astype(jnp.bfloat16), w4_ref[...],
                preferred_element_type=jnp.float32) + b4_ref[...]

    z_max = jnp.max(z, axis=-1, keepdims=True)
    s = z - z_max
    lse = jnp.log(jnp.sum(jnp.exp(s), axis=-1, keepdims=True))
    o_ref[...] = (s - lse).astype(o_ref.dtype)


@functools.partial(jax.jit, static_argnames=("tb",))
def net_forward(x, params, tb=1024):
    """x: (N, 784) float32. params: dict of w1,b1,...,w4,b4 (f32, (in,out))."""
    n = x.shape[0]

    # Batch tile: multiple of 8, no larger than the (8-rounded) batch, so small
    # batches need no padding and large batches amortize per-step overhead.
    n8 = ((n + 7) // 8) * 8
    tb_eff = min(tb, n8)
    n_pad = ((n + tb_eff - 1) // tb_eff) * tb_eff

    # Row-only padding, and only when actually required (no feature padding,
    # no dtype conversion pass on the host side).
    xp = x if n_pad == n else jnp.pad(x, ((0, n_pad - n), (0, 0)))

    w1 = params["w1"].astype(jnp.bfloat16)                    # (784, 64)
    w2 = params["w2"].astype(jnp.bfloat16)                    # (64, 64)
    w3 = params["w3"].astype(jnp.bfloat16)                    # (64, 64)
    w4 = params["w4"].astype(jnp.bfloat16)                    # (64, 10)

    b1 = params["b1"].reshape(1, HID).astype(jnp.float32)
    b2 = params["b2"].reshape(1, HID).astype(jnp.float32)
    b3 = params["b3"].reshape(1, HID).astype(jnp.float32)
    b4 = params["b4"].reshape(1, N_CLASSES).astype(jnp.float32)

    grid = (n_pad // tb_eff,)

    def const_spec(arr):
        return pl.BlockSpec(arr.shape, lambda i: (0, 0))

    flops = 2 * n_pad * (F_IN * HID + HID * HID + HID * HID + HID * N_CLASSES)
    bytes_accessed = (
        n_pad * F_IN * 4                       # x read (f32)
        + n_pad * N_CLASSES * 4                # output write (f32)
        + 2 * (w1.size + w2.size + w3.size + w4.size)
        + 4 * (b1.size + b2.size + b3.size + b4.size))
    transcendentals = n_pad * (N_CLASSES + 1)  # exp per class + log per row

    # Double-buffered f32 x tile + output tile + weights, with margin; keep the
    # scoped-VMEM request >= every chip's default but <= v7x's 64 MiB physical.
    vmem_needed = (2 * tb_eff * F_IN * 4 + 2 * tb_eff * N_CLASSES * 4
                   + (2 << 20))
    vmem_limit = min(max(vmem_needed, 32 << 20), 64 << 20)

    out = pl.pallas_call(
        mlp_kernel,
        out_shape=jax.ShapeDtypeStruct((n_pad, N_CLASSES), jnp.float32),
        grid=grid,
        in_specs=[
            pl.BlockSpec((tb_eff, F_IN), lambda i: (i, 0)),   # x tiles, pipelined
            const_spec(w1), const_spec(b1),
            const_spec(w2), const_spec(b2),
            const_spec(w3), const_spec(b3),
            const_spec(w4), const_spec(b4),
        ],
        out_specs=pl.BlockSpec((tb_eff, N_CLASSES), lambda i: (i, 0)),
        compiler_params=pltpu.CompilerParams(
            dimension_semantics=("parallel",),
            vmem_limit_bytes=vmem_limit),
        cost_estimate=pl.CostEstimate(
            flops=flops,
            transcendentals=transcendentals,
            bytes_accessed=bytes_accessed),
    )(xp, w1, b1, w2, b2, w3, b3, w4, b4)

    return out if n_pad == n else out[:n]


def init_params(key):
    # Deterministic init mimicking torch.nn.Linear default (+/- 1/sqrt(fan_in)).
    dims = [(F_IN, HID), (HID, HID), (HID, HID), (HID, N_CLASSES)]
    params = {}
    for i, (fan_in, fan_out) in enumerate(dims, start=1):
        key, kw, kb = jax.random.split(key, 3)
        bound = 1.0 / jnp.sqrt(jnp.float32(fan_in))
        params[f"w{i}"] = jax.random.uniform(
            kw, (fan_in, fan_out), jnp.float32, -bound, bound)
        params[f"b{i}"] = jax.random.uniform(
            kb, (fan_out,), jnp.float32, -bound, bound)
    return params


def reference_forward(x, params):
    # Pure-JAX reference with the same bf16-weight / f32-accumulate policy.
    h = x.astype(jnp.bfloat16)
    for i in range(1, 5):
        w = params[f"w{i}"].astype(jnp.bfloat16)
        b = params[f"b{i}"].astype(jnp.float32)
        z = jnp.dot(h, w, preferred_element_type=jnp.float32) + b
        if i < 4:
            h = jnp.maximum(z, 0.0).astype(jnp.bfloat16)
    return jax.nn.log_softmax(z, axis=-1)


if __name__ == "__main__":
    key = jax.random.PRNGKey(0)
    key, kx = jax.random.split(key)

    batch = 8
    x = jax.random.normal(kx, (batch, F_IN), jnp.float32)
    params = init_params(key)

    out = net_forward(x, params)
    out = jax.block_until_ready(out)

    assert out.shape == (batch, N_CLASSES)

    # Sanity 1: log_softmax rows should sum (in prob space) to ~1.
    row_sums = jnp.sum(jnp.exp(out), axis=1)
    assert bool(jnp.all(jnp.abs(row_sums - 1.0) < 1e-4))

    # Sanity 2: match the pure-JAX reference (same bf16 matmul policy).
    ref = reference_forward(x, params)
    assert bool(jnp.all(jnp.abs(out - ref) < 5e-2))

    print("KERNEL_OK")
</pallas_src>

<mosaic_0001>
module attributes {stable_mosaic.version = 11 : i64} {
  func.func @mlp_kernel(%arg0: i32, %arg1: memref<8x784xf32, #tpu.memory_space<vmem>>, %arg2: memref<784x64xbf16, #tpu.memory_space<vmem>>, %arg3: memref<1x64xf32, #tpu.memory_space<vmem>>, %arg4: memref<64x64xbf16, #tpu.memory_space<vmem>>, %arg5: memref<1x64xf32, #tpu.memory_space<vmem>>, %arg6: memref<64x64xbf16, #tpu.memory_space<vmem>>, %arg7: memref<1x64xf32, #tpu.memory_space<vmem>>, %arg8: memref<64x10xbf16, #tpu.memory_space<vmem>>, %arg9: memref<1x10xf32, #tpu.memory_space<vmem>>, %arg10: memref<8x10xf32, #tpu.memory_space<vmem>>) attributes {dimension_semantics = [#tpu.dimension_semantics<parallel>], iteration_bounds = array<i64: 1>, scalar_prefetch = 0 : i64, scratch_operands = 0 : i64, tpu.core_type = #tpu.core_type<tc>, window_params = [{transform_indices = @transform_0, window_bounds = array<i64: 8, 784>}, {pipeline_mode = #tpu.pipeline_mode<synchronous>, transform_indices = @transform_1, window_bounds = array<i64: 784, 64>}, {pipeline_mode = #tpu.pipeline_mode<synchronous>, transform_indices = @transform_2, window_bounds = array<i64: 1, 64>}, {pipeline_mode = #tpu.pipeline_mode<synchronous>, transform_indices = @transform_3, window_bounds = array<i64: 64, 64>}, {pipeline_mode = #tpu.pipeline_mode<synchronous>, transform_indices = @transform_4, window_bounds = array<i64: 1, 64>}, {pipeline_mode = #tpu.pipeline_mode<synchronous>, transform_indices = @transform_5, window_bounds = array<i64: 64, 64>}, {pipeline_mode = #tpu.pipeline_mode<synchronous>, transform_indices = @transform_6, window_bounds = array<i64: 1, 64>}, {pipeline_mode = #tpu.pipeline_mode<synchronous>, transform_indices = @transform_7, window_bounds = array<i64: 64, 10>}, {pipeline_mode = #tpu.pipeline_mode<synchronous>, transform_indices = @transform_8, window_bounds = array<i64: 1, 10>}, {transform_indices = @transform_9, window_bounds = array<i64: 8, 10>}]} {
    %c0 = arith.constant 0 : index
    %c0_0 = arith.constant 0 : index
    %0 = vector.load %arg1[%c0, %c0_0] : memref<8x784xf32, #tpu.memory_space<vmem>>, vector<8x784xf32>
    %1 = arith.truncf %0 : vector<8x784xf32> to vector<8x784xbf16>
    %c0_1 = arith.constant 0 : index
    %c0_2 = arith.constant 0 : index
    %2 = vector.load %arg2[%c0_1, %c0_2] : memref<784x64xbf16, #tpu.memory_space<vmem>>, vector<784x64xbf16>
    %cst = arith.constant dense<0.000000e+00> : vector<8x64xf32>
    %3 = tpu.matmul %1, %2, %cst {dimension_numbers = #tpu.dot_dimension_numbers<[1], [0], [0], [1], [0, 0, 1, 1], [], []>} : vector<8x784xbf16>, vector<784x64xbf16>, vector<8x64xf32> -> vector<8x64xf32>
    %c0_3 = arith.constant 0 : index
    %c0_4 = arith.constant 0 : index
    %4 = vector.load %arg3[%c0_3, %c0_4] : memref<1x64xf32, #tpu.memory_space<vmem>>, vector<1x64xf32>
    %5 = vector.broadcast %4 : vector<1x64xf32> to vector<8x64xf32>
    %6 = arith.addf %3, %5 : vector<8x64xf32>
    %cst_5 = arith.constant 0.000000e+00 : f32
    %7 = vector.broadcast %cst_5 : f32 to vector<8x64xf32>
    %8 = arith.maximumf %6, %7 : vector<8x64xf32>
    %9 = arith.truncf %8 : vector<8x64xf32> to vector<8x64xbf16>
    %c0_6 = arith.constant 0 : index
    %c0_7 = arith.constant 0 : index
    %10 = vector.load %arg4[%c0_6, %c0_7] : memref<64x64xbf16, #tpu.memory_space<vmem>>, vector<64x64xbf16>
    %cst_8 = arith.constant dense<0.000000e+00> : vector<8x64xf32>
    %11 = tpu.matmul %9, %10, %cst_8 {dimension_numbers = #tpu.dot_dimension_numbers<[1], [0], [0], [1], [0, 0, 1, 1], [], []>} : vector<8x64xbf16>, vector<64x64xbf16>, vector<8x64xf32> -> vector<8x64xf32>
    %c0_9 = arith.constant 0 : index
    %c0_10 = arith.constant 0 : index
    %12 = vector.load %arg5[%c0_9, %c0_10] : memref<1x64xf32, #tpu.memory_space<vmem>>, vector<1x64xf32>
    %13 = vector.broadcast %12 : vector<1x64xf32> to vector<8x64xf32>
    %14 = arith.addf %11, %13 : vector<8x64xf32>
    %cst_11 = arith.constant 0.000000e+00 : f32
    %15 = vector.broadcast %cst_11 : f32 to vector<8x64xf32>
    %16 = arith.maximumf %14, %15 : vector<8x64xf32>
    %17 = arith.truncf %16 : vector<8x64xf32> to vector<8x64xbf16>
    %c0_12 = arith.constant 0 : index
    %c0_13 = arith.constant 0 : index
    %18 = vector.load %arg6[%c0_12, %c0_13] : memref<64x64xbf16, #tpu.memory_space<vmem>>, vector<64x64xbf16>
    %cst_14 = arith.constant dense<0.000000e+00> : vector<8x64xf32>
    %19 = tpu.matmul %17, %18, %cst_14 {dimension_numbers = #tpu.dot_dimension_numbers<[1], [0], [0], [1], [0, 0, 1, 1], [], []>} : vector<8x64xbf16>, vector<64x64xbf16>, vector<8x64xf32> -> vector<8x64xf32>
    %c0_15 = arith.constant 0 : index
    %c0_16 = arith.constant 0 : index
    %20 = vector.load %arg7[%c0_15, %c0_16] : memref<1x64xf32, #tpu.memory_space<vmem>>, vector<1x64xf32>
    %21 = vector.broadcast %20 : vector<1x64xf32> to vector<8x64xf32>
    %22 = arith.addf %19, %21 : vector<8x64xf32>
    %cst_17 = arith.constant 0.000000e+00 : f32
    %23 = vector.broadcast %cst_17 : f32 to vector<8x64xf32>
    %24 = arith.maximumf %22, %23 : vector<8x64xf32>
    %25 = arith.truncf %24 : vector<8x64xf32> to vector<8x64xbf16>
    %c0_18 = arith.constant 0 : index
    %c0_19 = arith.constant 0 : index
    %26 = vector.load %arg8[%c0_18, %c0_19] : memref<64x10xbf16, #tpu.memory_space<vmem>>, vector<64x10xbf16>
    %cst_20 = arith.constant dense<0.000000e+00> : vector<8x10xf32>
    %27 = tpu.matmul %25, %26, %cst_20 {dimension_numbers = #tpu.dot_dimension_numbers<[1], [0], [0], [1], [0, 0, 1, 1], [], []>} : vector<8x64xbf16>, vector<64x10xbf16>, vector<8x10xf32> -> vector<8x10xf32>
    %c0_21 = arith.constant 0 : index
    %c0_22 = arith.constant 0 : index
    %28 = vector.load %arg9[%c0_21, %c0_22] : memref<1x10xf32, #tpu.memory_space<vmem>>, vector<1x10xf32>
    %29 = vector.broadcast %28 : vector<1x10xf32> to vector<8x10xf32>
    %30 = arith.addf %27, %29 : vector<8x10xf32>
    %cst_23 = arith.constant dense<0xFF800000> : vector<8xf32>
    %31 = vector.multi_reduction <maximumf>, %30, %cst_23 [1] : vector<8x10xf32> to vector<8xf32>
    %32 = vector.shape_cast %31 : vector<8xf32> to vector<8x1xf32>
    %33 = vector.broadcast %32 : vector<8x1xf32> to vector<8x10xf32>
    %34 = arith.subf %30, %33 : vector<8x10xf32>
    %35 = math.exp %34 : vector<8x10xf32>
    %cst_24 = arith.constant dense<0.000000e+00> : vector<8xf32>
    %36 = vector.multi_reduction <add>, %35, %cst_24 [1] : vector<8x10xf32> to vector<8xf32>
    %37 = vector.shape_cast %36 : vector<8xf32> to vector<8x1xf32>
    %38 = math.log %37 : vector<8x1xf32>
    %39 = vector.broadcast %38 : vector<8x1xf32> to vector<8x10xf32>
    %40 = arith.subf %34, %39 : vector<8x10xf32>
    %c0_25 = arith.constant 0 : index
    %c0_26 = arith.constant 0 : index
    %41 = vector.load %arg10[%c0_25, %c0_26] : memref<8x10xf32, #tpu.memory_space<vmem>>, vector<8x10xf32>
    tpu.vector_store %arg10[%c0_25, %c0_26], %40 {strides = array<i32>} : memref<8x10xf32, #tpu.memory_space<vmem>>, vector<8x10xf32>,
    return
  }
  func.func @transform_0(%arg0: i32) -> (i32, i32) {
    %c0_i32 = arith.constant 0 : i32
    %c0_i32_0 = arith.constant 0 : i32
    return %arg0, %c0_i32 : i32, i32
  }
  func.func @transform_1(%arg0: i32) -> (i32, i32) {
    %c0_i32 = arith.constant 0 : i32
    %c0_i32_0 = arith.constant 0 : i32
    %c0_i32_1 = arith.constant 0 : i32
    return %c0_i32, %c0_i32_0 : i32, i32
  }
  func.func @transform_2(%arg0: i32) -> (i32, i32) {
    %c0_i32 = arith.constant 0 : i32
    %c0_i32_0 = arith.constant 0 : i32
    %c0_i32_1 = arith.constant 0 : i32
    return %c0_i32, %c0_i32_0 : i32, i32
  }
  func.func @transform_3(%arg0: i32) -> (i32, i32) {
    %c0_i32 = arith.constant 0 : i32
    %c0_i32_0 = arith.constant 0 : i32
    %c0_i32_1 = arith.constant 0 : i32
    return %c0_i32, %c0_i32_0 : i32, i32
  }
  func.func @transform_4(%arg0: i32) -> (i32, i32) {
    %c0_i32 = arith.constant 0 : i32
    %c0_i32_0 = arith.constant 0 : i32
    %c0_i32_1 = arith.constant 0 : i32
    return %c0_i32, %c0_i32_0 : i32, i32
  }
  func.func @transform_5(%arg0: i32) -> (i32, i32) {
    %c0_i32 = arith.constant 0 : i32
    %c0_i32_0 = arith.constant 0 : i32
    %c0_i32_1 = arith.constant 0 : i32
    return %c0_i32, %c0_i32_0 : i32, i32
  }
  func.func @transform_6(%arg0: i32) -> (i32, i32) {
    %c0_i32 = arith.constant 0 : i32
    %c0_i32_0 = arith.constant 0 : i32
    %c0_i32_1 = arith.constant 0 : i32
    return %c0_i32, %c0_i32_0 : i32, i32
  }
  func.func @transform_7(%arg0: i32) -> (i32, i32) {
    %c0_i32 = arith.constant 0 : i32
    %c0_i32_0 = arith.constant 0 : i32
    %c0_i32_1 = arith.constant 0 : i32
    return %c0_i32, %c0_i32_0 : i32, i32
  }
  func.func @transform_8(%arg0: i32) -> (i32, i32) {
    %c0_i32 = arith.constant 0 : i32
    %c0_i32_0 = arith.constant 0 : i32
    %c0_i32_1 = arith.constant 0 : i32
    return %c0_i32, %c0_i32_0 : i32, i32
  }
  func.func @transform_9(%arg0: i32) -> (i32, i32) {
    %c0_i32 = arith.constant 0 : i32
    %c0_i32_0 = arith.constant 0 : i32
    return %arg0, %c0_i32 : i32, i32
  }
}

</mosaic_0001>

<bundles_post_ra>
// kernel: net_forward.1
= control target key start
LH: loop header
LB: loop body
LE: loop exit
PB: predicated region body
PF: predicated region fallthrough
CT: control target
= control target key end

     0   :  { %v1178_v44 = vmov 0.0   ;;  %vm1179_vm0 = vmmov 0   ;;  %vm447_vm1 = vcmask 130048   ;;  %s1486_s0 = inlined_call_operand.vmem [shape: f32[8,784], index: 0, kind: input, shape index: {}]   ;;  %s1487_s1 = inlined_call_operand.vmem [shape: bf16[784,64], index: 1, kind: input, shape index: {}]   ;;  %s1488_s2 = inlined_call_operand.vmem [shape: f32[1,64], index: 2, kind: input, shape index: {}]   ;;  %s1489_s3 = inlined_call_operand.vmem [shape: bf16[64,64], index: 3, kind: input, shape index: {}]   ;;  %s1490_s4 = inlined_call_operand.vmem [shape: f32[1,64], index: 4, kind: input, shape index: {}]   ;;  %s1491_s5 = inlined_call_operand.vmem [shape: bf16[64,64], index: 5, kind: input, shape index: {}]   ;;  %s1492_s6 = inlined_call_operand.vmem [shape: f32[1,64], index: 6, kind: input, shape index: {}]   ;;  %s1493_s7 = inlined_call_operand.vmem [shape: bf16[64,10], index: 7, kind: input, shape index: {}]   ;;  %s1494_s8 = inlined_call_operand.vmem [shape: f32[1,10], index: 8, kind: input, shape index: {}]   ;;  %s1495_s9 = inlined_call_operand.hbm [shape: f32[8,10], index: 9, kind: output, shape index: {}]  }
   0x1   :  { %v1089_v0 = vld [vmem:[%s1487_s1 + $0x40] sm:$0xff]   ;;  %v1093_v4 = vld [vmem:[%s1487_s1 + $0x48] sm:$0xff]   ;;  %v1097_v8 = vld [vmem:[%s1487_s1 + $0x50] sm:$0xff]  }
   0x2   :  { %v1090_v1 = vld [vmem:[%s1487_s1] sm:$0xff]   ;;  %961 = vmatprep.subr.bf16.mxu0 %v1089_v0  ;;  %v1094_v5 = vld [vmem:[%s1487_s1 + $0x8] sm:$0xff]   ;;  %v1098_v9 = vld [vmem:[%s1487_s1 + $0x10] sm:$0xff]  }
   0x3   :  { %v1091_v2 = vld [vmem:[%s1487_s1 + $0xc0] sm:$0xff]   ;;  %962 = vmatpush3.bf16.msra.mxu0 %v1090_v1  ;;  %v1095_v6 = vld [vmem:[%s1487_s1 + $0xc8] sm:$0xff]   ;;  %v1099_v10 = vld [vmem:[%s1487_s1 + $0xd0] sm:$0xff]  }
   0x4   :  { %v1092_v3 = vld [vmem:[%s1487_s1 + $0x80] sm:$0xff]   ;;  %983 = vmatprep.subr.bf16.mxu1 %v1091_v2  ;;  %963 = vmatprep.subr.bf16.mxu0 %v1093_v4  ;;  %v1096_v7 = vld [vmem:[%s1487_s1 + $0x88] sm:$0xff]   ;;  %v1100_v11 = vld [vmem:[%s1487_s1 + $0x90] sm:$0xff]  }
   0x5   :  { %984 = vmatpush3.bf16.msra.mxu1 %v1092_v3  ;;  %v1101_v12 = vld [vmem:[%s1487_s1 + $0x58] sm:$0xff]   ;;  %v1105_v16 = vld [vmem:[%s1487_s1 + $0x60] sm:$0xff]   ;;  %v1109_v20 = vld [vmem:[%s1487_s1 + $0x68] sm:$0xff]  }
   0x6   :  { %985 = vmatprep.subr.bf16.mxu1 %v1095_v6  ;;  %v1102_v13 = vld [vmem:[%s1487_s1 + $0x18] sm:$0xff]   ;;  %v1106_v17 = vld [vmem:[%s1487_s1 + $0x20] sm:$0xff]   ;;  %v1110_v21 = vld [vmem:[%s1487_s1 + $0x28] sm:$0xff]  }
   0x7   :  { %964 = vmatpush3.bf16.msra.mxu0 %v1094_v5  ;;  %v1103_v14 = vld [vmem:[%s1487_s1 + $0xd8] sm:$0xff]   ;;  %v1107_v18 = vld [vmem:[%s1487_s1 + $0xe0] sm:$0xff]   ;;  %v1111_v22 = vld [vmem:[%s1487_s1 + $0xe8] sm:$0xff]  }
   0x8   :  { %965 = vmatprep.subr.bf16.mxu0 %v1097_v8  ;;  %v1104_v15 = vld [vmem:[%s1487_s1 + $0x98] sm:$0xff]   ;;  %v1108_v19 = vld [vmem:[%s1487_s1 + $0xa0] sm:$0xff]   ;;  %v1112_v23 = vld [vmem:[%s1487_s1 + $0xa8] sm:$0xff]  }
   0x9   :  { %986 = vmatpush3.bf16.msra.mxu1 %v1096_v7  ;;  %v1113_v24 = vld [vmem:[%s1487_s1 + $0x70] sm:$0xff]   ;;  %v1117_v28 = vld [vmem:[%s1487_s1 + $0x78] sm:$0xff]   ;;  %v35_v31 = vld [vmem:[%s1486_s0 + $0x8] sm:$0xff] }
   0xa   :  { %987 = vmatprep.subr.bf16.mxu1 %v1099_v10  ;;  %v1114_v25 = vld [vmem:[%s1487_s1 + $0x30] sm:$0xff]   ;;  %v1118_v29 = vld [vmem:[%s1487_s1 + $0x38] sm:$0xff]   ;;  %v42_v32 = vpack.c.bf16 %v35_v31, %v35_v31  ;;  %v34_v34 = vld [vmem:[%s1486_s0] sm:$0xff] }
   0xb   :  { %966 = vmatpush3.bf16.msra.mxu0 %v1098_v9  ;;  %v1115_v26 = vld [vmem:[%s1487_s1 + $0xf0] sm:$0xff]   ;;  %v1119_v30 = vld [vmem:[%s1487_s1 + $0xf8] sm:$0xff]   ;;  %v41_v35 = vpack.c.bf16 %v34_v34, %v34_v34  ;;  %v1121_v36 = vld [vmem:[%s1487_s1 + $0x140] sm:$0xff]  }
   0xc   :  { %967 = vmatprep.subr.bf16.mxu0 %v1101_v12  ;;  %v1116_v27 = vld [vmem:[%s1487_s1 + $0xb0] sm:$0xff]   ;;  %v1120_v33 = vld [vmem:[%s1487_s1 + $0xb8] sm:$0xff]   ;;  %483 = vmatprep.mubr.bf16.mxu0 %v42_v32  ;;  %v1122_v39 = vld [vmem:[%s1487_s1 + $0x100] sm:$0xff]  }
   0xd   :  { %988 = vmatpush3.bf16.msra.mxu1 %v1100_v11  ;;  %v37_v37 = vld [vmem:[%s1486_s0 + $0x18] sm:$0xff]  ;;  %v36_v40 = vld [vmem:[%s1486_s0 + $0x10] sm:$0xff]  ;;  %v1123_v42 = vld [vmem:[%s1487_s1 + $0x148] sm:$0xff]  }
   0xe   :  { %989 = vmatprep.subr.bf16.mxu1 %v1103_v14  ;;  %v44_v38 = vpack.c.bf16 %v37_v37, %v37_v37  ;;  %v43_v41 = vpack.c.bf16 %v36_v40, %v36_v40  ;;  %v1124_v43 = vld [vmem:[%s1487_s1 + $0x108] sm:$0xff]   ;;  %v1125_v45 = vld [vmem:[%s1487_s1 + $0x150] sm:$0xff]   ;;  %v1127_v47 = vld [vmem:[%s1487_s1 + $0x158] sm:$0xff]  }
   0xf   :  { %968 = vmatpush3.bf16.msra.mxu0 %v1102_v13  ;;  %v1126_v46 = vld [vmem:[%s1487_s1 + $0x110] sm:$0xff]   ;;  %v1128_v48 = vld [vmem:[%s1487_s1 + $0x118] sm:$0xff]   ;;  %v1129_v49 = vld [vmem:[%s1487_s1 + $0x160] sm:$0xff]  }
  0x10   :  { %969 = vmatprep.subr.bf16.mxu0 %v1105_v16  ;;  %523 = vmatprep.mubr.bf16.mxu1 %v44_v38  ;;  %v1130_v50 = vld [vmem:[%s1487_s1 + $0x120] sm:$0xff]   ;;  %v1131_v51 = vld [vmem:[%s1487_s1 + $0x168] sm:$0xff]   ;;  %v1133_v55 = vld [vmem:[%s1487_s1 + $0x170] sm:$0xff]  }
  0x11   :  { %990 = vmatpush3.bf16.msra.mxu1 %v1104_v15  ;;  %v1132_v52 = vld [vmem:[%s1487_s1 + $0x128] sm:$0xff]   ;;  %v1137_v53 = vld [vmem:[%s1487_s1 + $0x180] sm:$0xff]   ;;  %v40_v57 = vld [vmem:[%s1486_s0 + $0x30] sm:$0xff] }
  0x12   :  { %991 = vmatprep.subr.bf16.mxu1 %v1107_v18  ;;  %v39_v54 = vld [vmem:[%s1486_s0 + $0x28] sm:$0xff]  ;;  %v47_v58 = vpack.c.bf16 %v40_v57, %v40_v57  ;;  %v1134_v59 = vld [vmem:[%s1487_s1 + $0x130] sm:$0xff]   ;;  %v1135_v60 = vld [vmem:[%s1487_s1 + $0x178] sm:$0xff]  }
  0x13   :  { %970 = vmatpush3.bf16.msra.mxu0 %v1106_v17  ;;  %v46_v56 = vpack.c.bf16 %v39_v54, %v39_v54 }
  0x14   :  { %971 = vmatprep.subr.bf16.mxu0 %v1109_v20 }
  0x15   :  { %992 = vmatpush3.bf16.msra.mxu1 %v1108_v19 }
  0x16   :  { %993 = vmatprep.subr.bf16.mxu1 %v1111_v22 }
  0x17   :  { %972 = vmatpush3.bf16.msra.mxu0 %v1110_v21 }
  0x18   :  { %973 = vmatprep.subr.bf16.mxu0 %v1113_v24 }
  0x19   :  { %994 = vmatpush3.bf16.msra.mxu1 %v1112_v23 }
  0x1a   :  { %995 = vmatprep.subr.bf16.mxu1 %v1115_v26 }
  0x1b   :  { %974 = vmatpush3.bf16.msra.mxu0 %v1114_v25 }
  0x1c   :  { %975 = vmatprep.subr.bf16.mxu0 %v1117_v28 }
  0x1d   :  { %996 = vmatpush3.bf16.msra.mxu1 %v1116_v27 }
  0x1e   :  { %997 = vmatprep.subr.bf16.mxu1 %v1119_v30 }
  0x1f   :  { %976 = vmatpush3.bf16.msra.mxu0 %v1118_v29 }
  0x20   :  { %1005 = vmatprep.subr.bf16.mxu0 %v1121_v36 }
  0x21   :  { %998 = vmatpush3.bf16.msra.mxu1 %v1120_v33 }
  0x22   :  { %484 = vmatmul.mubr.bf16.vlgmr.msra.gmra.mrb[0].mxu0 %v41_v35  ;;  %1044 = vmatprep.subr.bf16.mxu1 %v1178_v44 }
  0x23   :  { %1006 = vmatpush3.bf16.msra.mxu0 %v1122_v39  ;;  %563 = vmatprep.mubr.bf16.mxu0 %v46_v56 }
  0x24   :  { %524 = vmatmul.mubr.bf16.vlgmr.msra.gmra.mrb[0].mxu1 %v43_v41  ;;  %1007 = vmatprep.subr.bf16.mxu0 %v1123_v42 }
  0x25   :  { %1046 = vmatprep.mubr.msk.bf16.mxu1 %vm1179_vm0, %v1178_v44  ;;  %1045 = vmatpush3.bf16.msra.mxu1 %v1137_v53 }
  0x26   :  { %1050 = vmatprep.subr.bf16.mxu1 %v1178_v44 }
  0x27   :  { %1008 = vmatpush3.bf16.msra.mxu0 %v1124_v43 }
  0x28   :  { %1009 = vmatprep.subr.bf16.mxu0 %v1125_v45 }
  0x2b   :  { %1010 = vmatpush3.bf16.msra.mxu0 %v1126_v46 }
  0x2c   :  { %1011 = vmatprep.subr.bf16.mxu0 %v1127_v47  ;;  %1047 = vmatmul.mubr.msk.bf16.vlgmr.msra.gmra.mrb[4].mxu1 %vm447_vm1, %v47_v58 }
  0x2d   :  { %1058 = vmatprep.mubr.msk.bf16.mxu1 %vm1179_vm0, %v1178_v44 }
  0x2f   :  { %1012 = vmatpush3.bf16.msra.mxu0 %v1128_v48 }
  0x30   :  { %1013 = vmatprep.subr.bf16.mxu0 %v1129_v49 }
  0x33   :  { %1014 = vmatpush3.bf16.msra.mxu0 %v1130_v50 }
  0x34   :  { %1015 = vmatprep.subr.bf16.mxu0 %v1131_v51 }
  0x37   :  { %1016 = vmatpush3.bf16.msra.mxu0 %v1132_v52 }
  0x38   :  { %1017 = vmatprep.subr.bf16.mxu0 %v1133_v55 }
  0x39   :  { %14 = vsyncpa [#allocation3], 0  ;;  %v1136_v61 = vld [vmem:[%s1487_s1 + $0x138] sm:$0xff]   ;;  %v38_v62 = vld [vmem:[%s1486_s0 + $0x20] sm:$0xff]  ;;  %vm652_vm2 = vcmask 523264   ;;  %vm864_vm3 = vcmask 80896  }
  0x3a   :  { %v45_v63 = vpack.c.bf16 %v38_v62, %v38_v62  ;;  %v1138_v0 = vld [vmem:[%s1489_s3] sm:$0xff]   ;;  %v1139_v1 = vld [vmem:[%s1489_s3 + $0x8] sm:$0xff]   ;;  %v1140_v2 = vld [vmem:[%s1489_s3 + $0x10] sm:$0xff]  }
  0x3b   :  { %1018 = vmatpush3.bf16.msra.mxu0 %v1134_v59  ;;  %1051 = vmatpush3.bf16.msra.mxu1 %v1138_v0  ;;  %v1141_v3 = vld [vmem:[%s1489_s3 + $0x18] sm:$0xff]   ;;  %v892_v5 = vld [vmem:[%s1488_s2] ss:$0 sm:$0xff]  ;;  %v1143_v31 = vld [vmem:[%s1491_s5 + $0x8] sm:$0xff]  }
  0x3c   :  { %1019 = vmatprep.subr.bf16.mxu0 %v1135_v60  ;;  %1052 = vmatprep.subr.bf16.mxu1 %v1178_v44  ;;  %v1142_v29 = vld [vmem:[%s1491_s5] sm:$0xff]   ;;  %v1144_v32 = vld [vmem:[%s1491_s5 + $0x10] sm:$0xff]   ;;  %v1145_v33 = vld [vmem:[%s1491_s5 + $0x18] sm:$0xff]  }
  0x3d   :  { %v1146_v34 = vld [vmem:[%s1493_s7] sm:$0xff]   ;;  %v1147_v35 = vld [vmem:[%s1493_s7 + $0x8] sm:$0xff]   ;;  %v1148_v45 = vld [vmem:[%s1493_s7 + $0x10] sm:$0xff]  }
  0x3e   :  { %v943_v36 = vld [vmem:[%s1490_s4] ss:$0 sm:$0xff]  ;;  %v1149_v46 = vld [vmem:[%s1493_s7 + $0x18] sm:$0xff]  }
  0x3f   :  { %1020 = vmatpush3.bf16.msra.mxu0 %v1136_v61  ;;  %1053 = vmatpush3.bf16.msra.mxu1 %v1139_v1  ;;  %v949_v47 = vld [vmem:[%s1492_s6] ss:$0 sm:$0xff]  ;;  %s1180_s6 = smov [#allocation2]  }
  0x40   :  { %1074 = vmatprep.subr.bf16.mxu0 %v1178_v44  ;;  %1054 = vmatprep.subr.bf16.mxu1 %v1178_v44  ;;  %s884_s7 = sshll.u32 %s1180_s6, 4  ;;  %s885_s7 = int_to_ptr.vmem [resolvable:$true] %s884_s7 }
  0x41   :  { %p1159_p1 = scmp.lt.s32.totalorder %s885_s7, %s885_s7 }
  0x42   :  { %564 = vmatmul.mubr.bf16.vlgmr.msra.gmra.mrb[4].mxu0 %v45_v63 }
  0x43   :  { %1082 = vmatprep.mubr.msk.bf16.mxu0 %vm1179_vm0, %v1178_v44  ;;  %1055 = vmatpush3.bf16.msra.mxu1 %v1140_v2 }
  0x44   :  { %1056 = vmatprep.subr.bf16.mxu1 %v1178_v44  ;;  %1075 = vmatpush3.bf16.msra.mxu0 %v1146_v34 }
  0x45   :  { %1076 = vmatprep.subr.bf16.mxu0 %v1178_v44 }
  0x47   :  { %1057 = vmatpush3.bf16.msra.mxu1 %v1141_v3 }
  0x48   :  { %1062 = vmatprep.subr.bf16.mxu1 %v1178_v44  ;;  %1077 = vmatpush3.bf16.msra.mxu0 %v1147_v35 }
  0x49   :  { %1078 = vmatprep.subr.bf16.mxu0 %v1178_v44 }
  0x4c   :  { %1079 = vmatpush3.bf16.msra.mxu0 %v1148_v45 }
  0x4d   :  { %1080 = vmatprep.subr.bf16.mxu0 %v1178_v44 }
  0x50   :  { %1081 = vmatpush3.bf16.msra.mxu0 %v1149_v46 }
  0xf5   :  { %v977_v4 = vpop.f32.mrb[0].mxu0 }
  0xf6   :  { %v978_v6 = vpop.f32.mrb[1].mxu0 }
  0xf7   :  { %v979_v7 = vadd.f32 %v978_v6, %v977_v4  ;;  %v980_v8 = vpop.f32.mrb[2].mxu0  ;;  %v999_v9 = vpop.f32.mrb[0].mxu1 }
  0xf8   :  { %v981_v10 = vpop.f32.mrb[3].mxu0  ;;  %v1000_v12 = vpop.f32.mrb[1].mxu1 }
  0xf9   :  { %v486_v11 = vadd.f32 %v979_v7, %v892_v5  ;;  %v1001_v13 = vadd.f32 %v1000_v12, %v999_v9  ;;  %v1002_v14 = vpop.f32.mrb[2].mxu1 }
  0xfa   :  { %v1003_v15 = vpop.f32.mrb[3].mxu1 }
  0xfb   :  { %v526_v16 = vadd.f32 %v1001_v13, %v486_v11 }
  0xff   :  { %v605_v17 = vpop.f32.mrb[4].mxu1 }
 0x100   :  { %v1048_v18 = vpop.f32.mrb[5].mxu1 }
 0x101   :  { %v608_v19 = vpop.f32.mrb[6].mxu1 }
 0x102   :  { %v1049_v20 = vpop.f32.mrb[7].mxu1 }
 0x115   :  { %v1021_v21 = vpop.f32.mrb[4].mxu0 }
 0x116   :  { %v1022_v22 = vpop.f32.mrb[5].mxu0 }
 0x117   :  { %v1023_v23 = vadd.f32 %v1022_v22, %v1021_v21  ;;  %v1024_v24 = vpop.f32.mrb[6].mxu0 }
 0x118   :  { %v1025_v25 = vpop.f32.mrb[7].mxu0 }
 0x119   :  { %v566_v26 = vadd.f32 %v1023_v23, %v526_v16 }
 0x11b   :  { %v606_v27 = vadd.f32 %v605_v17, %v566_v26 }
 0x11d   :  { %v611_v28 = vmax.f32 %v606_v27, 0.0 }
 0x11f   :  { %v612_v30 = vpack.c.bf16 %v611_v28, %v611_v28 }
 0x121   :  { %1059 = vmatmul.mubr.msk.bf16.vlgmr.msra.gmra.mrb[8].mxu1 %vm652_vm2, %v612_v30 }
 0x122   :  { %1063 = vmatpush3.bf16.msra.mxu1 %v1142_v29  ;;  %1070 = vmatprep.mubr.msk.bf16.mxu1 %vm1179_vm0, %v1178_v44 }
 0x123   :  { %1064 = vmatprep.subr.bf16.mxu1 %v1178_v44 }
 0x126   :  { %1065 = vmatpush3.bf16.msra.mxu1 %v1143_v31 }
 0x127   :  { %1066 = vmatprep.subr.bf16.mxu1 %v1178_v44 }
 0x12a   :  { %1067 = vmatpush3.bf16.msra.mxu1 %v1144_v32 }
 0x12b   :  { %1068 = vmatprep.subr.bf16.mxu1 %v1178_v44  ;;  %v955_v44 = vld [vmem:[%s1494_s8] ss:$0 sm:$0xff]  ;;  %s1154_s8 = scalar_lea.vmem %s885_s7, 128 }
 0x12c   :  { %p1155_p0 = scmp.ne.s32.totalorder %s885_s7, %s1154_s8  ;;  %p1160_p2 = scmp.lt.s32.totalorder %s1154_s8, %s1154_s8 }
 0x12e   :  { %1069 = vmatpush3.bf16.msra.mxu1 %v1145_v33  ;;  %p1161_p3 = por %p1160_p2, %p1159_p1 }
 0x130   :  { %p1162_p4 = pnand %p1161_p3, %p1155_p0 }
 0x1f4   :  { %v690_v37 = vpop.f32.mrb[8].mxu1 }
 0x1f5   :  { %v691_v38 = vadd.f32 %v943_v36, %v690_v37  ;;  %v1060_v39 = vpop.f32.mrb[9].mxu1 }
 0x1f6   :  { %v693_v40 = vpop.f32.mrb[10].mxu1 }
 0x1f7   :  { %v696_v41 = vmax.f32 %v691_v38, 0.0  ;;  %v1061_v42 = vpop.f32.mrb[11].mxu1 }
 0x1f9   :  { %v697_v43 = vpack.c.bf16 %v696_v41, %v696_v41 }
 0x1fb   :  { %1071 = vmatmul.mubr.msk.bf16.vlgmr.msra.gmra.mrb[12].mxu1 %vm652_vm2, %v697_v43 }
 0x2ce   :  { %v774_v48 = vpop.f32.mrb[12].mxu1 }
 0x2cf   :  { %v775_v49 = vadd.f32 %v949_v47, %v774_v48  ;;  %v1072_v50 = vpop.f32.mrb[13].mxu1 }
 0x2d0   :  { %v777_v51 = vpop.f32.mrb[14].mxu1 }
 0x2d1   :  { %v780_v52 = vmax.f32 %v775_v49, 0.0  ;;  %v1073_v53 = vpop.f32.mrb[15].mxu1 }
 0x2d3   :  { %v781_v54 = vpack.c.bf16 %v780_v52, %v780_v52 }
 0x2d5   :  { %1083 = vmatmul.mubr.msk.bf16.vlgmr.msra.gmra.mrb[8].mxu0 %vm652_vm2, %v781_v54 }
 0x3a8   :  { %v858_v55 = vpop.f32.mrb[8].mxu0 }
 0x3a9   :  { %v859_v56 = vadd.f32 %v955_v44, %v858_v55  ;;  %v1084_v57 = vpop.f32.mrb[9].mxu0 }
 0x3aa   :  { %v861_v58 = vpop.f32.mrb[10].mxu0 }
 0x3ab   :  { %v1085_v59 = vpop.f32.mrb[11].mxu0  ;;  %v865_v60 = vsel %vm864_vm3, %v859_v56, -inf }
 0x3ac   :  { %866 = vmax.xlane.f32.xlu0 %v865_v60 }
 0x439   :  { %v867_v61 = vpop.xlane.xlu0 %866 }
 0x43a   :  { %v868_v62 = vsub.f32 %v859_v56, %v867_v61 }
 0x43c   :  { %v869_v63 = vmul.f32 1.442695, %v868_v62 }
 0x43e   :  { %1150 = vpow2.f32 %v869_v63 }
 0x448   :  { %v1151_v0 = vpop.eup %1150 }
 0x449   :  { %v871_v1 = vsel %vm864_vm3, %v1151_v0, 0.0 }
 0x44a   :  { %872 = vadd.xlane.f32.xlu0 %v871_v1 }
 0x4d7   :  { %v873_v2 = vpop.xlane.xlu0 %872 }
 0x4d8   :  { %1152 = vlog2.f32 %v873_v2 }
 0x4e2   :  { %v1153_v3 = vpop.eup %1152 }
 0x4e3   :  { %v875_v4 = vmul.f32 0.6931472, %v1153_v3 }
 0x4e5   :  { %v876_v5 = vsub.f32 %v868_v62, %v875_v4 }
 0x4e7   :  { %877 = vst.msk [vmem:[#allocation2] sm:$0xff] %vm864_vm3, %v876_v5 }
 0x4e8   :  { %1165 = shalt.err (!%p1162_p4)
}
 0x4e9   :  { %s1166_s21 = scalar_lea.hbm %s1495_s9, 128 }
 0x4ea   :  { %p1167_p5 = scmp.ne.s32.totalorder %s1495_s9, %s1166_s21  ;;  %p1170_p6 = scmp.lt.u32.totalorder %s1166_s21, %s1495_s9 }
 0x4ec   :  { %p1172_p7 = pnand %p1170_p6, %p1167_p5 }
 0x4ee   :  { %1175 = shalt.err (!%p1172_p7)
}
 0x4ef   :  { %887 = dma.vmem_to_hbm [thread:$0]  %s885_s7, 128, %s1495_s9, [#allocation3]  }
 0x4f0   :  { %1176 = dma.done.wait [#allocation3], 128  }
 0x4f1   :  { %1177 = vsyncadd [#allocation3], 4294967168 }
 0x4f2   :  { %891 = vsyncpa [#allocation3], 1 }

</bundles_post_ra>
